<compile_context>
chip_gen: v5e
topology: v5e:2x2
jax: 0.10.0
libtpu: 0.0.40
codegen_flags: <defaults>
</compile_context>

<pallas_src>
import functools
import math

import jax
import jax.numpy as jnp
from jax.experimental import pallas as pl
from jax.experimental.pallas import tpu as pltpu


# ----------------------------------------------------------------------------
# Fused kernel: projections + per-head attention + output projection
# ----------------------------------------------------------------------------
def mha_fused_kernel(xq_ref, xk_ref, xv_ref,
                     wq_ref, bq_ref, wk_ref, bk_ref, wv_ref, bv_ref,
                     wo_ref, bo_ref,
                     o_ref, *, n_head, d_k, b_tile, l_q, l_k, inv_scale):
    """Processes one batch tile (b_tile batch rows) per grid step."""
    d_model = n_head * d_k
    rows_q = b_tile * l_q
    rows_k = b_tile * l_k

    # Flatten the batch tile into the matmul M dimension (leading-axis merge
    # only; the lane dim is unchanged, so this is layout-free).
    xq = xq_ref[...].reshape(rows_q, d_model)   # bf16
    xk = xk_ref[...].reshape(rows_k, d_model)   # bf16
    xv = xv_ref[...].reshape(rows_k, d_model)   # bf16

    # Q/K/V projections: bf16 operands on the MXU, f32 accumulation, f32 bias.
    q = jnp.dot(xq, wq_ref[...], preferred_element_type=jnp.float32) + bq_ref[...]
    k = jnp.dot(xk, wk_ref[...], preferred_element_type=jnp.float32) + bk_ref[...]
    v = jnp.dot(xv, wv_ref[...], preferred_element_type=jnp.float32) + bv_ref[...]

    # Fold 1/sqrt(d_K) into Q: touches rows_q*d_model elems instead of Lq*Lk.
    q = q * inv_scale

    # Per-head scaled-dot-product attention, held entirely in vregs (no VMEM
    # scratch, no masked sub-128-lane stores).  Heads / batch rows are static
    # slices of the projection slabs; operands are cast to bf16 right before
    # each MXU call.  Trip counts are tiny (b_tile * n_head), so a fully
    # unrolled static loop is fine here.
    # TODO(synk): switch to a fori_loop / extra grid axis once n_head or the
    #             sequence length grows enough for live ranges to matter.
    ctx_rows = []
    for b in range(b_tile):
        rq = slice(b * l_q, (b + 1) * l_q)
        rk = slice(b * l_k, (b + 1) * l_k)
        head_outs = []
        for h in range(n_head):
            cs = slice(h * d_k, (h + 1) * d_k)
            qh = q[rq, cs].astype(jnp.bfloat16)   # (l_q, d_k)
            kh = k[rk, cs].astype(jnp.bfloat16)   # (l_k, d_k)
            vh = v[rk, cs].astype(jnp.bfloat16)   # (l_k, d_k)
            # Contract the d_K axes directly -> no explicit transpose of k.
            s = jax.lax.dot_general(qh, kh, (((1,), (1,)), ((), ())),
                                    preferred_element_type=jnp.float32)  # (l_q, l_k)
            m = jnp.max(s, axis=-1, keepdims=True)
            p = jnp.exp(s - m)
            denom_inv = pl.reciprocal(jnp.sum(p, axis=-1, keepdims=True),
                                      approx=True)
            alpha = (p * denom_inv).astype(jnp.bfloat16)
            head_outs.append(
                jnp.dot(alpha, vh, preferred_element_type=jnp.float32))
        ctx_rows.append(head_outs[0] if n_head == 1
                        else jnp.concatenate(head_outs, axis=-1))
    ctx = ctx_rows[0] if b_tile == 1 else jnp.concatenate(ctx_rows, axis=0)

    # Output projection straight off the register-resident context; single
    # lane-dense (rows_q, d_model) store.
    out = jnp.dot(ctx.astype(jnp.bfloat16), wo_ref[...],
                  preferred_element_type=jnp.float32) + bo_ref[...]
    o_ref[...] = out.reshape(b_tile, l_q, d_model).astype(o_ref.dtype)


# ----------------------------------------------------------------------------
# Wrapper
# ----------------------------------------------------------------------------
def multi_head_attention(params, Q_ipt, K_ipt, V_ipt, n_head, b_tile=None):
    """Pallas implementation of MultiHeadAttention.forward (Mask=None, eval)."""
    bs, l_q, d_model = Q_ipt.shape
    l_k = K_ipt.shape[1]
    l_v = V_ipt.shape[1]
    assert l_k == l_v, "K and V sequence lengths must match"
    d_k = d_model // n_head
    assert n_head * d_k == d_model, "Embed size needs to be divisible by heads"

    if b_tile is None:
        # Amortize per-grid-step overhead by packing batch rows into the MXU M
        # dimension, but keep >= 2 grid steps when bs >= 2 so the "parallel"
        # batch axis can be sharded across both v7x TensorCores.
        rows_target = max(1, 128 // max(l_q, 1))
        b_tile = max(1, min(bs // 2 if bs >= 2 else 1, rows_target))
        while bs % b_tile:
            b_tile -= 1
    assert bs % b_tile == 0

    inv_scale = 1.0 / math.sqrt(d_k)   # Python float: safe to close over
    out_dtype = Q_ipt.dtype
    bf16 = jnp.bfloat16

    # bf16 MXU operands (accumulation stays f32 inside the kernel); halves
    # weight / activation VMEM + HBM traffic.
    xq = Q_ipt.astype(bf16)
    xk = K_ipt.astype(bf16)
    xv = V_ipt.astype(bf16)
    wq = params["wq_w"].astype(bf16)
    wk = params["wk_w"].astype(bf16)
    wv = params["wv_w"].astype(bf16)
    wo = params["fc_w"].astype(bf16)

    def b2(b):  # biases stay f32, as (1, D) rows for lane-major broadcast
        return b.reshape(1, d_model).astype(jnp.float32)

    kern = functools.partial(mha_fused_kernel, n_head=n_head, d_k=d_k,
                             b_tile=b_tile, l_q=l_q, l_k=l_k,
                             inv_scale=inv_scale)

    act_q_spec = pl.BlockSpec((b_tile, l_q, d_model), lambda i: (i, 0, 0))
    act_k_spec = pl.BlockSpec((b_tile, l_k, d_model), lambda i: (i, 0, 0))
    w_spec = pl.BlockSpec((d_model, d_model), lambda i: (0, 0))
    b_spec = pl.BlockSpec((1, d_model), lambda i: (0, 0))

    return pl.pallas_call(
        kern,
        out_shape=jax.ShapeDtypeStruct((bs, l_q, d_model), out_dtype),
        grid_spec=pltpu.PrefetchScalarGridSpec(
            num_scalar_prefetch=0,
            grid=(bs // b_tile,),
            in_specs=[
                act_q_spec, act_k_spec, act_k_spec,
                w_spec, b_spec,   # WQ
                w_spec, b_spec,   # WK
                w_spec, b_spec,   # WV
                w_spec, b_spec,   # fc_out
            ],
            out_specs=pl.BlockSpec((b_tile, l_q, d_model), lambda i: (i, 0, 0)),
        ),
        compiler_params=pltpu.CompilerParams(
            dimension_semantics=("parallel",),
            vmem_limit_bytes=32 * 1024 * 1024,
        ),
    )(
        xq, xk, xv,
        wq, b2(params["wq_b"]),
        wk, b2(params["wk_b"]),
        wv, b2(params["wv_b"]),
        wo, b2(params["fc_b"]),
    )


# ----------------------------------------------------------------------------
# Pure-JAX reference (mirrors the PyTorch forward, Mask=None, eval mode)
# ----------------------------------------------------------------------------
def reference_mha(params, Q_ipt, K_ipt, V_ipt, n_head):
    bs, l_q, d_model = Q_ipt.shape
    l_k = K_ipt.shape[1]
    d_k = d_model // n_head
    scale = math.sqrt(d_k)
    Q = Q_ipt @ params["wq_w"] + params["wq_b"]
    K = K_ipt @ params["wk_w"] + params["wk_b"]
    V = V_ipt @ params["wv_w"] + params["wv_b"]
    Qh = Q.reshape(bs, l_q, n_head, d_k).transpose(0, 2, 1, 3)
    Kh = K.reshape(bs, l_k, n_head, d_k).transpose(0, 2, 1, 3)
    Vh = V.reshape(bs, l_k, n_head, d_k).transpose(0, 2, 1, 3)
    e = jnp.einsum("bhqd,bhkd->bhqk", Qh, Kh) / scale
    alpha = jax.nn.softmax(e, axis=-1)
    out = jnp.einsum("bhqk,bhkd->bhqd", alpha, Vh)
    out = out.transpose(0, 2, 1, 3).reshape(bs, l_q, d_model)
    return out @ params["fc_w"] + params["fc_b"]


# ----------------------------------------------------------------------------
# Main
# ----------------------------------------------------------------------------
if __name__ == "__main__":
    d_model = 32
    n_head = 4
    bs = 2
    seq = 8

    key = jax.random.PRNGKey(0)
    keys = jax.random.split(key, 12)
    bound = 1.0 / math.sqrt(d_model)  # PyTorch nn.Linear default init scale

    def uinit(k, shape):
        return jax.random.uniform(k, shape, jnp.float32, -bound, bound)

    params = {
        "wq_w": uinit(keys[0], (d_model, d_model)), "wq_b": uinit(keys[1], (d_model,)),
        "wk_w": uinit(keys[2], (d_model, d_model)), "wk_b": uinit(keys[3], (d_model,)),
        "wv_w": uinit(keys[4], (d_model, d_model)), "wv_b": uinit(keys[5], (d_model,)),
        "fc_w": uinit(keys[6], (d_model, d_model)), "fc_b": uinit(keys[7], (d_model,)),
    }

    Q_ipt = jax.random.normal(keys[8], (bs, seq, d_model), jnp.float32)
    K_ipt = jax.random.normal(keys[9], (bs, seq, d_model), jnp.float32)
    V_ipt = jax.random.normal(keys[10], (bs, seq, d_model), jnp.float32)

    out = multi_head_attention(params, Q_ipt, K_ipt, V_ipt, n_head)
    out = jax.block_until_ready(out)

    ref = reference_mha(params, Q_ipt, K_ipt, V_ipt, n_head)
    assert out.shape == (bs, seq, d_model)
    # Tolerance accounts for bf16 MXU operands (f32 accumulation) and the
    # approximate EUP reciprocal in the softmax denominator; the f32 reference
    # mirrors the PyTorch module exactly.
    assert jnp.allclose(out, ref, atol=3e-2, rtol=3e-2), "mismatch vs reference"

    print("KERNEL_OK")
</pallas_src>

<mosaic_0001>
module attributes {stable_mosaic.version = 11 : i64} {
  func.func @mha_fused_kernel(%arg0: i32, %arg1: memref<1x8x32xbf16, #tpu.memory_space<vmem>>, %arg2: memref<1x8x32xbf16, #tpu.memory_space<vmem>>, %arg3: memref<1x8x32xbf16, #tpu.memory_space<vmem>>, %arg4: memref<32x32xbf16, #tpu.memory_space<vmem>>, %arg5: memref<1x32xf32, #tpu.memory_space<vmem>>, %arg6: memref<32x32xbf16, #tpu.memory_space<vmem>>, %arg7: memref<1x32xf32, #tpu.memory_space<vmem>>, %arg8: memref<32x32xbf16, #tpu.memory_space<vmem>>, %arg9: memref<1x32xf32, #tpu.memory_space<vmem>>, %arg10: memref<32x32xbf16, #tpu.memory_space<vmem>>, %arg11: memref<1x32xf32, #tpu.memory_space<vmem>>, %arg12: memref<1x8x32xf32, #tpu.memory_space<vmem>>) attributes {dimension_semantics = [#tpu.dimension_semantics<parallel>], iteration_bounds = array<i64: 2>, scalar_prefetch = 0 : i64, scratch_operands = 0 : i64, tpu.core_type = #tpu.core_type<tc>, window_params = [{transform_indices = @transform_0, window_bounds = array<i64: 1, 8, 32>}, {transform_indices = @transform_1, window_bounds = array<i64: 1, 8, 32>}, {transform_indices = @transform_2, window_bounds = array<i64: 1, 8, 32>}, {pipeline_mode = #tpu.pipeline_mode<synchronous>, transform_indices = @transform_3, window_bounds = array<i64: 32, 32>}, {pipeline_mode = #tpu.pipeline_mode<synchronous>, transform_indices = @transform_4, window_bounds = array<i64: 1, 32>}, {pipeline_mode = #tpu.pipeline_mode<synchronous>, transform_indices = @transform_5, window_bounds = array<i64: 32, 32>}, {pipeline_mode = #tpu.pipeline_mode<synchronous>, transform_indices = @transform_6, window_bounds = array<i64: 1, 32>}, {pipeline_mode = #tpu.pipeline_mode<synchronous>, transform_indices = @transform_7, window_bounds = array<i64: 32, 32>}, {pipeline_mode = #tpu.pipeline_mode<synchronous>, transform_indices = @transform_8, window_bounds = array<i64: 1, 32>}, {pipeline_mode = #tpu.pipeline_mode<synchronous>, transform_indices = @transform_9, window_bounds = array<i64: 32, 32>}, {pipeline_mode = #tpu.pipeline_mode<synchronous>, transform_indices = @transform_10, window_bounds = array<i64: 1, 32>}, {transform_indices = @transform_11, window_bounds = array<i64: 1, 8, 32>}]} {
    %c0 = arith.constant 0 : index
    %c0_0 = arith.constant 0 : index
    %c0_1 = arith.constant 0 : index
    %0 = vector.load %arg1[%c0, %c0_0, %c0_1] : memref<1x8x32xbf16, #tpu.memory_space<vmem>>, vector<1x8x32xbf16>
    %1 = vector.shape_cast %0 : vector<1x8x32xbf16> to vector<8x32xbf16>
    %c0_2 = arith.constant 0 : index
    %c0_3 = arith.constant 0 : index
    %c0_4 = arith.constant 0 : index
    %2 = vector.load %arg2[%c0_2, %c0_3, %c0_4] : memref<1x8x32xbf16, #tpu.memory_space<vmem>>, vector<1x8x32xbf16>
    %3 = vector.shape_cast %2 : vector<1x8x32xbf16> to vector<8x32xbf16>
    %c0_5 = arith.constant 0 : index
    %c0_6 = arith.constant 0 : index
    %c0_7 = arith.constant 0 : index
    %4 = vector.load %arg3[%c0_5, %c0_6, %c0_7] : memref<1x8x32xbf16, #tpu.memory_space<vmem>>, vector<1x8x32xbf16>
    %5 = vector.shape_cast %4 : vector<1x8x32xbf16> to vector<8x32xbf16>
    %c0_8 = arith.constant 0 : index
    %c0_9 = arith.constant 0 : index
    %6 = vector.load %arg4[%c0_8, %c0_9] : memref<32x32xbf16, #tpu.memory_space<vmem>>, vector<32x32xbf16>
    %cst = arith.constant dense<0.000000e+00> : vector<8x32xf32>
    %7 = tpu.matmul %1, %6, %cst {dimension_numbers = #tpu.dot_dimension_numbers<[1], [0], [0], [1], [0, 0, 1, 1], [], []>} : vector<8x32xbf16>, vector<32x32xbf16>, vector<8x32xf32> -> vector<8x32xf32>
    %c0_10 = arith.constant 0 : index
    %c0_11 = arith.constant 0 : index
    %8 = vector.load %arg5[%c0_10, %c0_11] : memref<1x32xf32, #tpu.memory_space<vmem>>, vector<1x32xf32>
    %9 = vector.broadcast %8 : vector<1x32xf32> to vector<8x32xf32>
    %10 = arith.addf %7, %9 : vector<8x32xf32>
    %c0_12 = arith.constant 0 : index
    %c0_13 = arith.constant 0 : index
    %11 = vector.load %arg6[%c0_12, %c0_13] : memref<32x32xbf16, #tpu.memory_space<vmem>>, vector<32x32xbf16>
    %cst_14 = arith.constant dense<0.000000e+00> : vector<8x32xf32>
    %12 = tpu.matmul %3, %11, %cst_14 {dimension_numbers = #tpu.dot_dimension_numbers<[1], [0], [0], [1], [0, 0, 1, 1], [], []>} : vector<8x32xbf16>, vector<32x32xbf16>, vector<8x32xf32> -> vector<8x32xf32>
    %c0_15 = arith.constant 0 : index
    %c0_16 = arith.constant 0 : index
    %13 = vector.load %arg7[%c0_15, %c0_16] : memref<1x32xf32, #tpu.memory_space<vmem>>, vector<1x32xf32>
    %14 = vector.broadcast %13 : vector<1x32xf32> to vector<8x32xf32>
    %15 = arith.addf %12, %14 : vector<8x32xf32>
    %c0_17 = arith.constant 0 : index
    %c0_18 = arith.constant 0 : index
    %16 = vector.load %arg8[%c0_17, %c0_18] : memref<32x32xbf16, #tpu.memory_space<vmem>>, vector<32x32xbf16>
    %cst_19 = arith.constant dense<0.000000e+00> : vector<8x32xf32>
    %17 = tpu.matmul %5, %16, %cst_19 {dimension_numbers = #tpu.dot_dimension_numbers<[1], [0], [0], [1], [0, 0, 1, 1], [], []>} : vector<8x32xbf16>, vector<32x32xbf16>, vector<8x32xf32> -> vector<8x32xf32>
    %c0_20 = arith.constant 0 : index
    %c0_21 = arith.constant 0 : index
    %18 = vector.load %arg9[%c0_20, %c0_21] : memref<1x32xf32, #tpu.memory_space<vmem>>, vector<1x32xf32>
    %19 = vector.broadcast %18 : vector<1x32xf32> to vector<8x32xf32>
    %20 = arith.addf %17, %19 : vector<8x32xf32>
    %cst_22 = arith.constant 0.353553385 : f32
    %21 = vector.broadcast %cst_22 : f32 to vector<8x32xf32>
    %22 = arith.mulf %10, %21 : vector<8x32xf32>
    %23 = vector.extract_strided_slice %22 {offsets = [0, 0], sizes = [8, 8], strides = [1, 1]} : vector<8x32xf32> to vector<8x8xf32>
    %24 = arith.truncf %23 : vector<8x8xf32> to vector<8x8xbf16>
    %25 = vector.extract_strided_slice %15 {offsets = [0, 0], sizes = [8, 8], strides = [1, 1]} : vector<8x32xf32> to vector<8x8xf32>
    %26 = arith.truncf %25 : vector<8x8xf32> to vector<8x8xbf16>
    %27 = vector.extract_strided_slice %20 {offsets = [0, 0], sizes = [8, 8], strides = [1, 1]} : vector<8x32xf32> to vector<8x8xf32>
    %28 = arith.truncf %27 : vector<8x8xf32> to vector<8x8xbf16>
    %cst_23 = arith.constant dense<0.000000e+00> : vector<8x8xf32>
    %29 = tpu.matmul %24, %26, %cst_23 {dimension_numbers = #tpu.dot_dimension_numbers<[1], [1], [0], [0], [0, 0, 1, 0], [], []>} : vector<8x8xbf16>, vector<8x8xbf16>, vector<8x8xf32> -> vector<8x8xf32>
    %cst_24 = arith.constant dense<0xFF800000> : vector<8xf32>
    %30 = vector.multi_reduction <maximumf>, %29, %cst_24 [1] : vector<8x8xf32> to vector<8xf32>
    %31 = vector.shape_cast %30 : vector<8xf32> to vector<8x1xf32>
    %32 = vector.broadcast %31 : vector<8x1xf32> to vector<8x8xf32>
    %33 = arith.subf %29, %32 : vector<8x8xf32>
    %34 = math.exp %33 : vector<8x8xf32>
    %cst_25 = arith.constant dense<0.000000e+00> : vector<8xf32>
    %35 = vector.multi_reduction <add>, %34, %cst_25 [1] : vector<8x8xf32> to vector<8xf32>
    %36 = vector.shape_cast %35 : vector<8xf32> to vector<8x1xf32>
    %37 = tpu.reciprocal %36 {approx = true} : vector<8x1xf32> -> vector<8x1xf32>
    %38 = vector.broadcast %37 : vector<8x1xf32> to vector<8x8xf32>
    %39 = arith.mulf %34, %38 : vector<8x8xf32>
    %40 = arith.truncf %39 : vector<8x8xf32> to vector<8x8xbf16>
    %cst_26 = arith.constant dense<0.000000e+00> : vector<8x8xf32>
    %41 = tpu.matmul %40, %28, %cst_26 {dimension_numbers = #tpu.dot_dimension_numbers<[1], [0], [0], [1], [0, 0, 1, 1], [], []>} : vector<8x8xbf16>, vector<8x8xbf16>, vector<8x8xf32> -> vector<8x8xf32>
    %42 = vector.extract_strided_slice %22 {offsets = [0, 8], sizes = [8, 8], strides = [1, 1]} : vector<8x32xf32> to vector<8x8xf32>
    %43 = arith.truncf %42 : vector<8x8xf32> to vector<8x8xbf16>
    %44 = vector.extract_strided_slice %15 {offsets = [0, 8], sizes = [8, 8], strides = [1, 1]} : vector<8x32xf32> to vector<8x8xf32>
    %45 = arith.truncf %44 : vector<8x8xf32> to vector<8x8xbf16>
    %46 = vector.extract_strided_slice %20 {offsets = [0, 8], sizes = [8, 8], strides = [1, 1]} : vector<8x32xf32> to vector<8x8xf32>
    %47 = arith.truncf %46 : vector<8x8xf32> to vector<8x8xbf16>
    %cst_27 = arith.constant dense<0.000000e+00> : vector<8x8xf32>
    %48 = tpu.matmul %43, %45, %cst_27 {dimension_numbers = #tpu.dot_dimension_numbers<[1], [1], [0], [0], [0, 0, 1, 0], [], []>} : vector<8x8xbf16>, vector<8x8xbf16>, vector<8x8xf32> -> vector<8x8xf32>
    %cst_28 = arith.constant dense<0xFF800000> : vector<8xf32>
    %49 = vector.multi_reduction <maximumf>, %48, %cst_28 [1] : vector<8x8xf32> to vector<8xf32>
    %50 = vector.shape_cast %49 : vector<8xf32> to vector<8x1xf32>
    %51 = vector.broadcast %50 : vector<8x1xf32> to vector<8x8xf32>
    %52 = arith.subf %48, %51 : vector<8x8xf32>
    %53 = math.exp %52 : vector<8x8xf32>
    %cst_29 = arith.constant dense<0.000000e+00> : vector<8xf32>
    %54 = vector.multi_reduction <add>, %53, %cst_29 [1] : vector<8x8xf32> to vector<8xf32>
    %55 = vector.shape_cast %54 : vector<8xf32> to vector<8x1xf32>
    %56 = tpu.reciprocal %55 {approx = true} : vector<8x1xf32> -> vector<8x1xf32>
    %57 = vector.broadcast %56 : vector<8x1xf32> to vector<8x8xf32>
    %58 = arith.mulf %53, %57 : vector<8x8xf32>
    %59 = arith.truncf %58 : vector<8x8xf32> to vector<8x8xbf16>
    %cst_30 = arith.constant dense<0.000000e+00> : vector<8x8xf32>
    %60 = tpu.matmul %59, %47, %cst_30 {dimension_numbers = #tpu.dot_dimension_numbers<[1], [0], [0], [1], [0, 0, 1, 1], [], []>} : vector<8x8xbf16>, vector<8x8xbf16>, vector<8x8xf32> -> vector<8x8xf32>
    %61 = vector.extract_strided_slice %22 {offsets = [0, 16], sizes = [8, 8], strides = [1, 1]} : vector<8x32xf32> to vector<8x8xf32>
    %62 = arith.truncf %61 : vector<8x8xf32> to vector<8x8xbf16>
    %63 = vector.extract_strided_slice %15 {offsets = [0, 16], sizes = [8, 8], strides = [1, 1]} : vector<8x32xf32> to vector<8x8xf32>
    %64 = arith.truncf %63 : vector<8x8xf32> to vector<8x8xbf16>
    %65 = vector.extract_strided_slice %20 {offsets = [0, 16], sizes = [8, 8], strides = [1, 1]} : vector<8x32xf32> to vector<8x8xf32>
    %66 = arith.truncf %65 : vector<8x8xf32> to vector<8x8xbf16>
    %cst_31 = arith.constant dense<0.000000e+00> : vector<8x8xf32>
    %67 = tpu.matmul %62, %64, %cst_31 {dimension_numbers = #tpu.dot_dimension_numbers<[1], [1], [0], [0], [0, 0, 1, 0], [], []>} : vector<8x8xbf16>, vector<8x8xbf16>, vector<8x8xf32> -> vector<8x8xf32>
    %cst_32 = arith.constant dense<0xFF800000> : vector<8xf32>
    %68 = vector.multi_reduction <maximumf>, %67, %cst_32 [1] : vector<8x8xf32> to vector<8xf32>
    %69 = vector.shape_cast %68 : vector<8xf32> to vector<8x1xf32>
    %70 = vector.broadcast %69 : vector<8x1xf32> to vector<8x8xf32>
    %71 = arith.subf %67, %70 : vector<8x8xf32>
    %72 = math.exp %71 : vector<8x8xf32>
    %cst_33 = arith.constant dense<0.000000e+00> : vector<8xf32>
    %73 = vector.multi_reduction <add>, %72, %cst_33 [1] : vector<8x8xf32> to vector<8xf32>
    %74 = vector.shape_cast %73 : vector<8xf32> to vector<8x1xf32>
    %75 = tpu.reciprocal %74 {approx = true} : vector<8x1xf32> -> vector<8x1xf32>
    %76 = vector.broadcast %75 : vector<8x1xf32> to vector<8x8xf32>
    %77 = arith.mulf %72, %76 : vector<8x8xf32>
    %78 = arith.truncf %77 : vector<8x8xf32> to vector<8x8xbf16>
    %cst_34 = arith.constant dense<0.000000e+00> : vector<8x8xf32>
    %79 = tpu.matmul %78, %66, %cst_34 {dimension_numbers = #tpu.dot_dimension_numbers<[1], [0], [0], [1], [0, 0, 1, 1], [], []>} : vector<8x8xbf16>, vector<8x8xbf16>, vector<8x8xf32> -> vector<8x8xf32>
    %80 = vector.extract_strided_slice %22 {offsets = [0, 24], sizes = [8, 8], strides = [1, 1]} : vector<8x32xf32> to vector<8x8xf32>
    %81 = arith.truncf %80 : vector<8x8xf32> to vector<8x8xbf16>
    %82 = vector.extract_strided_slice %15 {offsets = [0, 24], sizes = [8, 8], strides = [1, 1]} : vector<8x32xf32> to vector<8x8xf32>
    %83 = arith.truncf %82 : vector<8x8xf32> to vector<8x8xbf16>
    %84 = vector.extract_strided_slice %20 {offsets = [0, 24], sizes = [8, 8], strides = [1, 1]} : vector<8x32xf32> to vector<8x8xf32>
    %85 = arith.truncf %84 : vector<8x8xf32> to vector<8x8xbf16>
    %cst_35 = arith.constant dense<0.000000e+00> : vector<8x8xf32>
    %86 = tpu.matmul %81, %83, %cst_35 {dimension_numbers = #tpu.dot_dimension_numbers<[1], [1], [0], [0], [0, 0, 1, 0], [], []>} : vector<8x8xbf16>, vector<8x8xbf16>, vector<8x8xf32> -> vector<8x8xf32>
    %cst_36 = arith.constant dense<0xFF800000> : vector<8xf32>
    %87 = vector.multi_reduction <maximumf>, %86, %cst_36 [1] : vector<8x8xf32> to vector<8xf32>
    %88 = vector.shape_cast %87 : vector<8xf32> to vector<8x1xf32>
    %89 = vector.broadcast %88 : vector<8x1xf32> to vector<8x8xf32>
    %90 = arith.subf %86, %89 : vector<8x8xf32>
    %91 = math.exp %90 : vector<8x8xf32>
    %cst_37 = arith.constant dense<0.000000e+00> : vector<8xf32>
    %92 = vector.multi_reduction <add>, %91, %cst_37 [1] : vector<8x8xf32> to vector<8xf32>
    %93 = vector.shape_cast %92 : vector<8xf32> to vector<8x1xf32>
    %94 = tpu.reciprocal %93 {approx = true} : vector<8x1xf32> -> vector<8x1xf32>
    %95 = vector.broadcast %94 : vector<8x1xf32> to vector<8x8xf32>
    %96 = arith.mulf %91, %95 : vector<8x8xf32>
    %97 = arith.truncf %96 : vector<8x8xf32> to vector<8x8xbf16>
    %cst_38 = arith.constant dense<0.000000e+00> : vector<8x8xf32>
    %98 = tpu.matmul %97, %85, %cst_38 {dimension_numbers = #tpu.dot_dimension_numbers<[1], [0], [0], [1], [0, 0, 1, 1], [], []>} : vector<8x8xbf16>, vector<8x8xbf16>, vector<8x8xf32> -> vector<8x8xf32>
    %99 = tpu.concatenate %41, %60, %79, %98 in 1 : vector<8x8xf32>, vector<8x8xf32>, vector<8x8xf32>, vector<8x8xf32> -> vector<8x32xf32>
    %100 = arith.truncf %99 : vector<8x32xf32> to vector<8x32xbf16>
    %c0_39 = arith.constant 0 : index
    %c0_40 = arith.constant 0 : index
    %101 = vector.load %arg10[%c0_39, %c0_40] : memref<32x32xbf16, #tpu.memory_space<vmem>>, vector<32x32xbf16>
    %cst_41 = arith.constant dense<0.000000e+00> : vector<8x32xf32>
    %102 = tpu.matmul %100, %101, %cst_41 {dimension_numbers = #tpu.dot_dimension_numbers<[1], [0], [0], [1], [0, 0, 1, 1], [], []>} : vector<8x32xbf16>, vector<32x32xbf16>, vector<8x32xf32> -> vector<8x32xf32>
    %c0_42 = arith.constant 0 : index
    %c0_43 = arith.constant 0 : index
    %103 = vector.load %arg11[%c0_42, %c0_43] : memref<1x32xf32, #tpu.memory_space<vmem>>, vector<1x32xf32>
    %104 = vector.broadcast %103 : vector<1x32xf32> to vector<8x32xf32>
    %105 = arith.addf %102, %104 : vector<8x32xf32>
    %106 = vector.shape_cast %105 : vector<8x32xf32> to vector<1x8x32xf32>
    %c0_44 = arith.constant 0 : index
    %c0_45 = arith.constant 0 : index
    %c0_46 = arith.constant 0 : index
    %107 = vector.load %arg12[%c0_44, %c0_45, %c0_46] : memref<1x8x32xf32, #tpu.memory_space<vmem>>, vector<1x8x32xf32>
    tpu.vector_store %arg12[%c0_44, %c0_45, %c0_46], %106 {strides = array<i32>} : memref<1x8x32xf32, #tpu.memory_space<vmem>>, vector<1x8x32xf32>,
    return
  }
  func.func @transform_0(%arg0: i32) -> (i32, i32, i32) {
    %c0_i32 = arith.constant 0 : i32
    %c0_i32_0 = arith.constant 0 : i32
    %c0_i32_1 = arith.constant 0 : i32
    return %arg0, %c0_i32, %c0_i32_0 : i32, i32, i32
  }
  func.func @transform_1(%arg0: i32) -> (i32, i32, i32) {
    %c0_i32 = arith.constant 0 : i32
    %c0_i32_0 = arith.constant 0 : i32
    %c0_i32_1 = arith.constant 0 : i32
    return %arg0, %c0_i32, %c0_i32_0 : i32, i32, i32
  }
  func.func @transform_2(%arg0: i32) -> (i32, i32, i32) {
    %c0_i32 = arith.constant 0 : i32
    %c0_i32_0 = arith.constant 0 : i32
    %c0_i32_1 = arith.constant 0 : i32
    return %arg0, %c0_i32, %c0_i32_0 : i32, i32, i32
  }
  func.func @transform_3(%arg0: i32) -> (i32, i32) {
    %c0_i32 = arith.constant 0 : i32
    %c0_i32_0 = arith.constant 0 : i32
    %c0_i32_1 = arith.constant 0 : i32
    return %c0_i32, %c0_i32_0 : i32, i32
  }
  func.func @transform_4(%arg0: i32) -> (i32, i32) {
    %c0_i32 = arith.constant 0 : i32
    %c0_i32_0 = arith.constant 0 : i32
    %c0_i32_1 = arith.constant 0 : i32
    return %c0_i32, %c0_i32_0 : i32, i32
  }
  func.func @transform_5(%arg0: i32) -> (i32, i32) {
    %c0_i32 = arith.constant 0 : i32
    %c0_i32_0 = arith.constant 0 : i32
    %c0_i32_1 = arith.constant 0 : i32
    return %c0_i32, %c0_i32_0 : i32, i32
  }
  func.func @transform_6(%arg0: i32) -> (i32, i32) {
    %c0_i32 = arith.constant 0 : i32
    %c0_i32_0 = arith.constant 0 : i32
    %c0_i32_1 = arith.constant 0 : i32
    return %c0_i32, %c0_i32_0 : i32, i32
  }
  func.func @transform_7(%arg0: i32) -> (i32, i32) {
    %c0_i32 = arith.constant 0 : i32
    %c0_i32_0 = arith.constant 0 : i32
    %c0_i32_1 = arith.constant 0 : i32
    return %c0_i32, %c0_i32_0 : i32, i32
  }
  func.func @transform_8(%arg0: i32) -> (i32, i32) {
    %c0_i32 = arith.constant 0 : i32
    %c0_i32_0 = arith.constant 0 : i32
    %c0_i32_1 = arith.constant 0 : i32
    return %c0_i32, %c0_i32_0 : i32, i32
  }
  func.func @transform_9(%arg0: i32) -> (i32, i32) {
    %c0_i32 = arith.constant 0 : i32
    %c0_i32_0 = arith.constant 0 : i32
    %c0_i32_1 = arith.constant 0 : i32
    return %c0_i32, %c0_i32_0 : i32, i32
  }
  func.func @transform_10(%arg0: i32) -> (i32, i32) {
    %c0_i32 = arith.constant 0 : i32
    %c0_i32_0 = arith.constant 0 : i32
    %c0_i32_1 = arith.constant 0 : i32
    return %c0_i32, %c0_i32_0 : i32, i32
  }
  func.func @transform_11(%arg0: i32) -> (i32, i32, i32) {
    %c0_i32 = arith.constant 0 : i32
    %c0_i32_0 = arith.constant 0 : i32
    %c0_i32_1 = arith.constant 0 : i32
    return %arg0, %c0_i32, %c0_i32_0 : i32, i32, i32
  }
}

</mosaic_0001>

<bundles_post_ra>
// kernel: tpu_custom_call.1
= control target key start
LH: loop header
LB: loop body
LE: loop exit
PB: predicated region body
PF: predicated region fallthrough
CT: control target
= control target key end

     0   :  { %s1959_s0 = inlined_call_operand.hbm [shape: bf16[2,8,32], index: 0, kind: input, shape index: {}]   ;;  %s1960_s1 = inlined_call_operand.hbm [shape: bf16[2,8,32], index: 1, kind: input, shape index: {}]   ;;  %s1961_s2 = inlined_call_operand.hbm [shape: bf16[2,8,32], index: 2, kind: input, shape index: {}]   ;;  %s1962_s3 = inlined_call_operand.hbm [shape: bf16[32,32], index: 3, kind: input, shape index: {}]   ;;  %s1963_s4 = inlined_call_operand.vmem [shape: f32[1,32], index: 4, kind: input, shape index: {}]   ;;  %s1964_s5 = inlined_call_operand.hbm [shape: bf16[32,32], index: 5, kind: input, shape index: {}]   ;;  %s1965_s6 = inlined_call_operand.vmem [shape: f32[1,32], index: 6, kind: input, shape index: {}]   ;;  %s1966_s7 = inlined_call_operand.hbm [shape: bf16[32,32], index: 7, kind: input, shape index: {}]   ;;  %s1967_s8 = inlined_call_operand.vmem [shape: f32[1,32], index: 8, kind: input, shape index: {}]   ;;  %s1968_s9 = inlined_call_operand.hbm [shape: bf16[32,32], index: 9, kind: input, shape index: {}]   ;;  %s1969_s10 = inlined_call_operand.vmem [shape: f32[1,32], index: 10, kind: input, shape index: {}]   ;;  %s1970_s11 = inlined_call_operand.hbm [shape: f32[2,8,32], index: 11, kind: output, shape index: {}]  }
   0x1   :  { %1982 = sst [smem:[#allocation25_spill]] %s1960_s1 }
   0x2   :  { %1983 = sst [smem:[#allocation26_spill]] %s1962_s3 }
   0x3   :  { %1984 = sst [smem:[#allocation27_spill]] %s1964_s5 }
   0x4   :  { %1985 = sst [smem:[#allocation28_spill]] %s1966_s7 }
   0x5   :  { %1986 = sst [smem:[#allocation29_spill]] %s1968_s9 }
   0x6   :  { %1987 = sst [smem:[#allocation30_spill]] %s1969_s10 }
   0x7   :  { %16 = vsyncpa [#allocation3], 0 }
   0x8   :  { %18 = vsyncpa [#allocation3 + $0x1], 0 }
   0x9   :  { %19 = vsyncpa [#allocation6], 0 }
   0xa   :  { %21 = vsyncpa [#allocation6 + $0x1], 0 }
   0xb   :  { %22 = vsyncpa [#allocation9], 0 }
   0xc   :  { %23 = vsyncpa [#allocation12], 0 }
   0xd   :  { %24 = vsyncpa [#allocation4], 0 }
   0xe   :  { %26 = vsyncpa [#allocation4 + $0x1], 0  ;;  %s1672_s17 = smov 0   ;;  %s1674_s18 = smov 0  }
   0xf   :  { %s1676_s19 = smov 0   ;;  %s1678_s20 = smov 0  }
  0x10 LB: > { %1988 = sst [smem:[#allocation20_spill]] %s1586_s17  ;;  %s1696_s24 = sadd.s32 4294967295, %s1598_s20   ;;  %s1598_s20 = sphi %s1678_s20, %s2016_s20   ;;  %s1594_s19 = sphi %s1676_s19, %s2020_s19   ;;  %s1590_s18 = sphi %s1674_s18, %s2019_s18   ;;  %s1586_s17 = sphi %s1672_s17, %s2018_s17  }
  0x11   : > { %1989 = sst [smem:[#allocation21_spill]] %s1598_s20  ;;  %p1108_p0 = scmp.ge.s32.totalorder %s1598_s20, 1 }
  0x12   : > { %s1990_s3 = sld [smem:[#allocation26_spill]]  ;;  %p1981_p1 = scmp.eq.s32.totalorder %s1696_s24, 0 }
  0x13   : > { %p309_p2 = scmp.lt.s32.totalorder %s1598_s20, 3  ;;  %s1600_s26 = smov [#allocation8]  }
  0x14   : > { %s322_s27 = sshll.u32 %s1600_s26, 4  ;;  %s1992_s7 = sld [smem:[#allocation28_spill]]  ;;  %s323_s27 = int_to_ptr.vmem [resolvable:$true] %s322_s27 }
  0x15   : > { %p1701_p3 = pnand %p1108_p0, %p309_p2  ;;  %s1601_s13 = smov [#allocation11]  }
  0x16   : > { %s356_s14 = sshll.u32 %s1601_s13, 4  ;;  %s1971_s15 = smov 64   ;;  %s357_s14 = int_to_ptr.vmem [resolvable:$true] %s356_s14 }
  0x17   : > { %p1209_p4 = pneg %p1701_p3  ;;  %s1973_s16 = smov 4  }
  0x18   : > { %s320_s23 = sshll.u32 %s1990_s3, 4  ;;  %s1107_s21 = sadd.s32 4294967294, %s1598_s20   ;;  %s321_s23 = int_to_ptr.hbm [resolvable:$true] %s320_s23 }
  0x19   : > { %p1713_p6 = pnand %p1209_p4, %p1981_p1  ;;  %s1729_s22 = sadd.s32 1, %s1598_s20  }
  0x1a   : > { %s354_s30 = sshll.u32 %s1992_s7, 4  ;;  %1994 = sst [smem:[#allocation22_spill]] %s1729_s22  ;;  %s355_s30 = int_to_ptr.hbm [resolvable:$true] %s354_s30 }
  0x1b   : > { %1212 = dma.hbm_to_vmem [thread:$0]  (!%p1713_p6), %s321_s23, 256, %s323_s27, [#allocation9], %s1971_s15, %s1971_s15, %s1973_s16  }
  0x1c   : > { %1218 = dma.hbm_to_vmem [thread:$0]  (!%p1713_p6), %s355_s30, 256, %s357_s14, [#allocation12], %s1971_s15, %s1971_s15, %s1973_s16  }
  0x1d   : > { %s36_s26 = ssub.s32 %s1598_s20, %s1729_s22  ;;  %s39_s28 = sadd.s32 1, %s1594_s19 }
  0x1e   : > { %p37_p7 = scmp.eq.s32.totalorder %s36_s26, 0  ;;  %p46_p8 = scmp.ne.s32.totalorder %s1594_s19, %s1590_s18 }
  0x1f   : > { %p47_p9 = scmp.eq.s32.totalorder %s1598_s20, 0  ;;  %p52_p10 = scmp.ne.s32.totalorder %s1590_s18, %s1586_s17 }
  0x20   : > { %s1740_s23 = scalar_select %p37_p7, %s1594_s19, %s39_s28  }
  0x21   : > { %p48_p11 = por %p47_p9, %p46_p8  ;;  %p1744_p12 = por %p1981_p1, %p52_p10 }
  0x22   : > { %1995 = sst [smem:[#allocation23_spill]] %s1740_s23  ;;  %p296_p13 = scmp.eq.s32.totalorder %s1696_s24, 1 }
  0x23   : > { %p302_p0 = scmp.eq.s32.totalorder %s1107_s21, 1  ;;  %p1240_p2 = scmp.lt.s32.totalorder %s1598_s20, 2 }
  0x24   : > { %s1977_s29 = sand.u32 1, %s1594_s19   ;;  %p1751_p4 = por %p296_p13, %p46_p8 }
  0x25   : > { %p1755_p5 = por %p302_p0, %p52_p10  ;;  %s1761_s14 = sshll.u32 %s1977_s29, 2 }
  0x26   : > { %s1764_s26 = sshll.u32 %s1598_s20, 2  ;;  %p1766_p7 = pnand %p1240_p2, %p48_p11 }
  0x27   : > { %s1998_s13 = scalar_select %p1755_p5, 1, 0 }
  0x28   : > { %s409_s21 = sand.u32 1, %s1598_s20   ;;  %s2001_s1 = sld [smem:[#allocation25_spill]] }
  0x29   : > { %1999 = sst [smem:[#allocation24_spill]] %s1998_s13  ;;  %s413_s23 = scalar_lea.vmem [#allocation5], %s1761_s14 }
  0x2a   : > { %s421_s22 = sshll.u32 %s413_s23, 4  ;;  %s1776_s29 = scalar_lea.sflag [#allocation6], %s409_s21  ;;  %s422_s22 = int_to_ptr.vmem [resolvable:$true] %s421_s22 }
  0x2b   : > { %p1374_p9 = pneg %p1766_p7 }
  0x2e   : > { %s417_s3 = scalar_lea.hbm %s2001_s1, %s1764_s26 }
  0x2f   : > { %s419_s7 = sshll.u32 %s417_s3, 4  ;;  %s1377_s3 = scalar_lea.hbm %s2001_s1, 8  ;;  %s420_s7 = int_to_ptr.hbm [resolvable:$true] %s419_s7 }
  0x30   : > { %s1370_s13 = sshra.s32 %s420_s7, 4  ;;  %s1371_s13 = int_to_ptr.hbm [resolvable:$true] %s1370_s13 }
  0x31   : > { %s1372_s17 = scalar_lea.hbm %s1371_s13, 4  ;;  %p1378_p13 = scmp.lt.s32.totalorder %s1371_s13, %s2001_s1 }
  0x32   : > { %p1373_p8 = scmp.ne.s32.totalorder %s1371_s13, %s1372_s17  ;;  %p1379_p0 = scmp.lt.s32.totalorder %s1377_s3, %s1372_s17 }
  0x34   : > { %p1375_p10 = pnand %p1374_p9, %p1373_p8  ;;  %p1380_p2 = por %p1379_p0, %p1378_p13 }
  0x36   : > { %p1376_p11 = pneg %p1375_p10 }
  0x38   : > { %p1381_p1 = pnand %p1380_p2, %p1376_p11 }
  0x3a   : > { %1384 = shalt.err (!%p1381_p1)
}
  0x3b   : > { %1228 = dma.hbm_to_vmem [thread:$0]  (!%p1766_p7), %s420_s7, 64, %s422_s22, %s1776_s29  }
  0x3c   : > { %s2002_s5 = sld [smem:[#allocation27_spill]]  ;;  %s1604_s15 = smov [#allocation10]  }
  0x3d   : > { %s339_s13 = sshll.u32 %s1604_s15, 4  ;;  %s2003_s9 = sld [smem:[#allocation29_spill]]  ;;  %s340_s13 = int_to_ptr.vmem [resolvable:$true] %s339_s13 }
  0x3e   : > { %s2004_s23 = smov 4   ;;  %s2005_s1 = smov 64  }
  0x3f   : > { %s1605_s7 = smov [#allocation13]   ;;  %s398_s15 = scalar_lea.hbm %s1959_s0, %s1764_s26 }
  0x40   : > { %s373_s22 = sshll.u32 %s1605_s7, 4  ;;  %s394_s17 = scalar_lea.vmem [#allocation2], %s1761_s14  ;;  %s374_s22 = int_to_ptr.vmem [resolvable:$true] %s373_s22 }
  0x41   : > { %s402_s3 = sshll.u32 %s394_s17, 4  ;;  %s403_s3 = int_to_ptr.vmem [resolvable:$true] %s402_s3 }
  0x42   : > { %s337_s20 = sshll.u32 %s2002_s5, 4  ;;  %s400_s5 = sshll.u32 %s398_s15, 4  ;;  %s338_s20 = int_to_ptr.hbm [resolvable:$true] %s337_s20  ;;  %s401_s5 = int_to_ptr.hbm [resolvable:$true] %s400_s5 }
  0x43   : > { %s371_s16 = sshll.u32 %s2003_s9, 4  ;;  %s1460_s9 = sshra.s32 %s401_s5, 4  ;;  %s372_s16 = int_to_ptr.hbm [resolvable:$true] %s371_s16  ;;  %s1461_s9 = int_to_ptr.hbm [resolvable:$true] %s1460_s9 }
  0x44   : > { %1215 = dma.hbm_to_vmem [thread:$0]  (!%p1713_p6), %s338_s20, 256, %s340_s13, [#allocation9], %s2005_s1, %s2005_s1, %s2004_s23  }
  0x45   : > { %1221 = dma.hbm_to_vmem [thread:$0]  (!%p1713_p6), %s372_s16, 256, %s374_s22, [#allocation12], %s2005_s1, %s2005_s1, %s2004_s23  }
  0x46   : > { %s2006_s20 = sand.u32 1, %s1594_s19   ;;  %s1462_s7 = scalar_lea.hbm %s1461_s9, 4 }
  0x47   : > { %s391_s13 = scalar_lea.sflag [#allocation3], %s2006_s20  ;;  %p1463_p1 = scmp.ne.s32.totalorder %s1461_s9, %s1462_s7 }
  0x48   : > { %s1467_s16 = scalar_lea.hbm %s1959_s0, 8  ;;  %p1468_p6 = scmp.lt.s32.totalorder %s1461_s9, %s1959_s0 }
  0x49   : > { %p1465_p8 = pnand %p1463_p1, %p1374_p9  ;;  %p1469_p11 = scmp.lt.s32.totalorder %s1467_s16, %s1462_s7 }
  0x4b   : > { %p1466_p10 = pneg %p1465_p8  ;;  %p1470_p13 = por %p1469_p11, %p1468_p6 }
  0x4d   : > { %p1471_p0 = pnand %p1470_p13, %p1466_p10 }
  0x4f   : > { %1474 = shalt.err (!%p1471_p0)
}
  0x50   : > { %1225 = dma.hbm_to_vmem [thread:$0]  (!%p1766_p7), %s401_s5, 64, %s403_s3, %s391_s13  }
  0x51   : > { %s436_s15 = scalar_lea.hbm %s1961_s2, %s1764_s26  ;;  %s432_s17 = scalar_lea.vmem [#allocation7], %s1761_s14 }
  0x52   : > { %s440_s20 = sshll.u32 %s432_s17, 4  ;;  %s438_s1 = sshll.u32 %s436_s15, 4  ;;  %s441_s20 = int_to_ptr.vmem [resolvable:$true] %s440_s20  ;;  %s439_s1 = int_to_ptr.hbm [resolvable:$true] %s438_s1 }
  0x53   : > { %s1490_s9 = sshra.s32 %s439_s1, 4  ;;  %s1497_s5 = scalar_lea.hbm %s1961_s2, 8  ;;  %s1491_s9 = int_to_ptr.hbm [resolvable:$true] %s1490_s9 }
  0x54   : > { %s1492_s7 = scalar_lea.hbm %s1491_s9, 4  ;;  %p1498_p10 = scmp.lt.s32.totalorder %s1491_s9, %s1961_s2 }
  0x55   : > { %p1493_p2 = scmp.ne.s32.totalorder %s1491_s9, %s1492_s7  ;;  %p1499_p6 = scmp.lt.s32.totalorder %s1497_s5, %s1492_s7 }
  0x57   : > { %p1495_p1 = pnand %p1493_p2, %p1374_p9  ;;  %p1500_p11 = por %p1499_p6, %p1498_p10 }
  0x59   : > { %p1496_p8 = pneg %p1495_p1 }
  0x5b   : > { %p1501_p13 = pnand %p1500_p11, %p1496_p8 }
  0x5d   : > { %1504 = shalt.err (!%p1501_p13)
}
  0x5e   : > { %1231 = dma.hbm_to_vmem [thread:$0]  (!%p1766_p7), %s439_s1, 64, %s441_s20, %s1776_s29  }
  0x5f   : > { %449 = sbr.rel (%p1701_p3) target bundleno = 1179 (0x49b), region = 64  ;;  %s1846_s14 = sand.u32 (!%p1701_p3), 1, %s1590_s18  }
  0x60   : > { %s1849_s26 = sshll.u32 (!%p1701_p3), %s1846_s14, 2  ;;  %s452_s23 = scalar_lea.sflag (!%p1701_p3), [#allocation3], %s1846_s14 }
  0x61   : > { %s455_s22 = scalar_lea.vmem (!%p1701_p3), [#allocation2], %s1849_s26 }
  0x64   : > { %1565 = dma.done.wait (%p1744_p12), %s452_s23, 64  }
  0x65   : > { %1567 = vsyncadd (%p1744_p12), %s452_s23, 4294967232  ;;  %s461_s25 = sand.u32 1, %s1696_s24   ;;  %s465_s28 = scalar_lea.vmem [#allocation5], %s1849_s26 }
  0x66   : > { %s462_s29 = scalar_lea.sflag [#allocation6], %s461_s25 }
  0x67   : > { %1569 = dma.done.wait (%p1744_p12), %s462_s29, 128  }
  0x68   : > { %1571 = vsyncadd (%p1744_p12), %s462_s29, 4294967168  ;;  %s475_s10 = scalar_lea.vmem [#allocation7], %s1849_s26  ;;  %p2007_p3 = scmp.eq.s32.totalorder %s1696_s24, 0 }
  0x6a   : > { %1573 = dma.done.wait (%p2007_p3), [#allocation9], 512   ;;  %p2008_p7 = pmov %p2007_p3 }
  0x6b   : > { %p2009_p9 = pmov %p2007_p3 }
  0x6c   : > { %1575 = vsyncadd (%p2008_p7), [#allocation9], 4294966784 }
  0x6d   : > { %1577 = dma.done.wait (%p2009_p9), [#allocation12], 512   ;;  %p2010_p0 = pmov %p2007_p3 }
  0x6e   : > { %v1178_v0 = vld [vmem:[#allocation8 + $0x8] sm:$0xff]  ;;  %v1180_v1 = vld [vmem:[#allocation10 + $0x8] sm:$0xff]  ;;  %v1177_v2 = vld [vmem:[#allocation8] sm:$0xff]  ;;  %vm569_vm0 = vcmask 261120   ;;  %vm662_vm1 = vcmask 64512   ;;  %s1606_s20 = smov 112  }
  0x6f   : > { %1579 = vsyncadd (%p2010_p0), [#allocation12], 4294966784  ;;  %579 = vmatpush.bf16.msra.mxu0 %v1178_v0  ;;  %615 = vmatpush.bf16.msra.mxu1 %v1180_v1  ;;  %v1179_v3 = vld [vmem:[#allocation10] sm:$0xff]  ;;  %v546_v4 = vld [vmem:[%s455_s22] sm:$0xf]  ;;  %s1607_s1 = smov 120  }
  0x70   : > { %v547_v5 = vld [vmem:[%s465_s28] sm:$0xf]  ;;  %v1290_v6 = vld [vmem:[%s1963_s4] ss:$0 sm:$0xff]  ;;  %s1608_s9 = smov 104   ;;  %v1181_v31 = vld [vmem:[#allocation11] sm:$0xff] }
  0x71   : > { %v1291_v7 = vld [vmem:[%s1965_s6] ss:$0 sm:$0xff]  ;;  %v548_v32 = vld [vmem:[%s475_s10] sm:$0xf]  ;;  %vm697_vm2 = vcmask 1043456   ;;  %s1609_s16 = smov 8  }
  0x72   : > { %v1182_v30 = vld [vmem:[#allocation11 + $0x8] sm:$0xff]  ;;  %s1610_s5 = smov 24   ;;  %s1611_s3 = smov 16   ;;  %vm898_vm3 = vcmask 130048   ;;  %vm900_vm4 = vcmask 195584  }
  0x73   : > { %580 = vmatpush.bf16.msra.mxu0 %v1177_v2  ;;  %616 = vmatpush.bf16.msra.mxu1 %v1179_v3  ;;  %v1292_v47 = vld [vmem:[%s1967_s8] ss:$0 sm:$0xff]  ;;  %s1174_s13 = sshll.u32 %s1696_s24, 3  ;;  %s1128_s26 = sshll.u32 %s1846_s14, 3 }
  0x74   : > { %651 = vmatpush.bf16.msra.mxu2 %v1182_v30  ;;  %s951_s25 = scalar_lea.hbm %s1970_s11, %s1174_s13  ;;  %s2011_s10 = sld [smem:[#allocation30_spill]] }
  0x75   : > { %s544_s27 = scalar_lea.vmem [#allocation14], %s1128_s26  ;;  %s955_s15 = sshll.u32 %s951_s25, 4  ;;  %s956_s15 = int_to_ptr.hbm [resolvable:$true] %s955_s15 }
  0x76   : > { %1137 = vmatmul.msk.bf16.vlgmr.msra.gmra.mxu0 %vm569_vm0, %v546_v4  ;;  %1146 = vmatmul.msk.bf16.vlgmr.msra.gmra.mxu1 %vm569_vm0, %v547_v5  ;;  %s953_s21 = sshll.u32 %s544_s27, 4  ;;  %s941_s24 = scalar_lea.sflag [#allocation4], %s1846_s14  ;;  %s954_s21 = int_to_ptr.vmem [resolvable:$true] %s953_s21 }
  0x77   : > { %s1534_s17 = sshra.s32 %s956_s15, 4  ;;  %s1540_s7 = scalar_lea.hbm %s1970_s11, 16  ;;  %s1535_s17 = int_to_ptr.hbm [resolvable:$true] %s1534_s17 }
  0x78   : > { %652 = vmatpush.bf16.msra.mxu2 %v1181_v31  ;;  %p1541_p8 = scmp.lt.s32.totalorder %s1535_s17, %s1970_s11 }
  0x7b   : > { %1155 = vmatmul.msk.bf16.vlgmr.msra.gmra.mxu2 %vm569_vm0, %v548_v32 }
  0xf3   : > { %v582_v8 = vpop.f32.mrf.mxu0  ;;  %v618_v9 = vpop.f32.mrf.mxu1 }
  0xf4   : > { %v583_v10 = vadd.f32 %v1290_v6, %v582_v8  ;;  %v619_v11 = vadd.f32 %v1291_v7, %v618_v9 }
  0xf6   : > { %v658_v12 = vmul.f32 0.35355338, %v583_v10  ;;  %v660_v13 = vpack.c.bf16 %v619_v11, %v619_v11 }
  0xf8   : > { %v659_v14 = vpack.c.bf16 %v658_v12, %v658_v12  ;;  %775 = vrot.lane.b32.xlu1 %v660_v13, %s1606_s20  ;;  %718 = vrot.lane.b32.xlu0 %v660_v13, %s1607_s1  ;;  %v667_v15 = vsel %vm662_vm1, %v660_v13, 0 }
  0xf9   : > { %676 = vmatpush.bf16.xpose.msra.mxu3 %v667_v15 }
  0xfa   : > { %773 = vrot.lane.b32.xlu2 %v659_v14, %s1606_s20 }
  0xfb   : > { %v584_v16 = vpop.f32.mrf.mxu0  ;;  %v620_v17 = vpop.f32.mrf.mxu1 }
  0xfe   : > { %v654_v48 = vpop.f32.mrf.mxu2 }
  0xff   : > { %v655_v49 = vadd.f32 %v1292_v47, %v654_v48 }
 0x100   : > { %831 = vrot.lane.b32.xlu1 %v660_v13, %s1608_s9  ;;  %715 = vrot.lane.b32.xlu0 %v659_v14, %s1607_s1 }
 0x101   : > { %1156 = vmatmul.msk.bf16.vlgmr.msra.gmra.mxu3 %vm662_vm1, %v659_v14  ;;  %v661_v50 = vpack.c.bf16 %v655_v49, %v655_v49 }
 0x102   : > { %829 = vrot.lane.b32.xlu2 %v659_v14, %s1608_s9 }
 0x103   : > { %v699_v51 = vsel %vm697_vm2, %v661_v50, 0 }
 0x104   : > { %708 = vmatpush.bf16.msrb.mxu0 %v699_v51 }
 0x106   : > { %v656_v53 = vpop.f32.mrf.mxu2 }
 0x154   : > { %v774_v22 = vpop.permute.xlu2 %773 }
 0x15c   : > { %v830_v26 = vpop.permute.xlu2 %829 }
 0x16a   : > { %v776_v18 = vpop.permute.xlu1 %775  ;;  %v719_v19 = vpop.permute.xlu0 %718 }
 0x16b   : > { %v724_v20 = vsel %vm662_vm1, %v719_v19, 0  ;;  %v781_v21 = vsel %vm662_vm1, %v776_v18, 0 }
 0x16c   : > { %733 = vmatpush.bf16.xpose.msrb.mxu1 %v724_v20  ;;  %790 = vmatpush.bf16.xpose.msrb.mxu3 %v781_v21 }
 0x172   : > { %v832_v23 = vpop.permute.xlu1 %831  ;;  %v716_v24 = vpop.permute.xlu0 %715 }
 0x173   : > { %v837_v25 = vsel %vm662_vm1, %v832_v23, 0  ;;  %1158 = vmatmul.msk.bf16.vlgmr.msrb.gmra.mxu1 %vm662_vm1, %v716_v24  ;;  %1160 = vmatmul.msk.bf16.vlgmr.msrb.gmra.mxu3 %vm662_vm1, %v774_v22 }
 0x174   : > { %846 = vmatpush.bf16.xpose.msra.mxu1 %v837_v25 }
 0x183   : > { %1162 = vmatmul.msk.bf16.vlgmr.msra.gmra.mxu1 %vm662_vm1, %v830_v26 }
 0x184   : > { %v678_v27 = vpop.f32.mrf.mxu3 }
 0x185   : > { %v682_v28 = vsel %vm662_vm1, %v678_v27, -inf }
 0x186   : > { %683 = vmax.xlane.f32.xlu1 %v682_v28 }
 0x18c   : > { %v680_v29 = vpop.f32.mrf.mxu3 }
 0x1f0   : > { %v735_v33 = vpop.f32.mrf.mxu1 }
 0x1f1   : > { %v739_v34 = vsel %vm662_vm1, %v735_v33, -inf }
 0x1f2   : > { %740 = vmax.xlane.f32.xlu0 %v739_v34  ;;  %v1184_v34 = vld [vmem:[#allocation13 + $0x8] sm:$0xff] }
 0x1f3   : > { %932 = vmatpush.bf16.msra.mxu3 %v1184_v34 }
 0x1f6   : > { %v792_v35 = vpop.f32.mrf.mxu3 }
 0x1f7   : > { %v796_v46 = vsel %vm662_vm1, %v792_v35, -inf }
 0x1f8   : > { %v737_v36 = vpop.f32.mrf.mxu1 }
 0x1f9   : > { %v684_v37 = vpop.xlane.xlu1 %683 }
 0x1fa   : > { %v685_v38 = vsub.f32 %v678_v27, %v684_v37 }
 0x1fc   : > { %v686_v39 = vmul.f32 1.442695, %v685_v38 }
 0x1fe   : > { %1294 = vpow2.f32 %v686_v39  ;;  %v794_v40 = vpop.f32.mrf.mxu3 }
 0x200   : > { %v848_v41 = vpop.f32.mrf.mxu1 }
 0x201   : > { %v852_v42 = vsel %vm662_vm1, %v848_v41, -inf }
 0x202   : > { %853 = vmax.xlane.f32.xlu2 %v852_v42 }
 0x204   : > { %v1295_v43 = vpop.eup %1294 }
 0x205   : > { %v688_v44 = vsel %vm662_vm1, %v1295_v43, 0.0 }
 0x206   : > { %689 = vadd.xlane.f32.xlu1 %v688_v44 }
 0x208   : > { %v850_v45 = vpop.f32.mrf.mxu1 }
 0x20a   : > { %797 = vmax.xlane.f32.xlu2 %v796_v46 }
 0x222   : > { %752 = vrot.lane.b32.xlu2 %v661_v50, %s1607_s1 }
 0x265   : > { %v741_v52 = vpop.xlane.xlu0 %740 }
 0x266   : > { %v742_v54 = vsub.f32 %v735_v33, %v741_v52 }
 0x268   : > { %v743_v55 = vmul.f32 1.442695, %v742_v54 }
 0x26a   : > { %1296 = vpow2.f32 %v743_v55 }
 0x270   : > { %v1297_v56 = vpop.eup %1296 }
 0x271   : > { %v745_v57 = vsel %vm662_vm1, %v1297_v56, 0.0 }
 0x272   : > { %746 = vadd.xlane.f32.xlu0 %v745_v57 }
 0x275   : > { %v854_v58 = vpop.xlane.xlu2 %853 }
 0x276   : > { %v855_v59 = vsub.f32 %v848_v41, %v854_v58 }
 0x278   : > { %v856_v60 = vmul.f32 1.442695, %v855_v59 }
 0x279   : > { %v690_v61 = vpop.xlane.xlu1 %689 }
 0x27a   : > { %1298 = vpow2.f32 %v856_v60 }
 0x27b   : > { %1300 = vrcp.f32 %v690_v61 }
 0x27d   : > { %v798_v62 = vpop.xlane.xlu2 %797 }
 0x27e   : > { %v799_v63 = vsub.f32 %v792_v35, %v798_v62  ;;  %v1183_v35 = vld [vmem:[#allocation13] sm:$0xff] }
 0x27f   : > { %933 = vmatpush.bf16.msra.mxu3 %v1183_v35 }
 0x280   : > { %v1299_v0 = vpop.eup %1298  ;;  %v800_v1 = vmul.f32 1.442695, %v799_v63 }
 0x281   : > { %v1301_v2 = vpop.eup %1300  ;;  %v858_v3 = vsel %vm662_vm1, %v1299_v0, 0.0 }
 0x282   : > { %v692_v4 = vmul.f32 %v1301_v2, %v1295_v43  ;;  %1302 = vpow2.f32 %v800_v1  ;;  %859 = vadd.xlane.f32.xlu0 %v858_v3  ;;  %v1293_v43 = vld [vmem:[%s2011_s10] ss:$0 sm:$0xff] }
 0x284   : > { %v693_v5 = vpack.c.bf16 %v692_v4, %v692_v4 }
 0x285   : > { %v753_v8 = vpop.permute.xlu2 %752 }
 0x286   : > { %1157 = vmatmul.msk.bf16.vlgmr.msrb.gmra.mxu0 %vm662_vm1, %v693_v5  ;;  %v758_v9 = vsel %vm697_vm2, %v753_v8, 0 }
 0x287   : > { %767 = vmatpush.bf16.msrb.mxu2 %v758_v9 }
 0x288   : > { %v1303_v6 = vpop.eup %1302 }
 0x289   : > { %v802_v7 = vsel %vm662_vm1, %v1303_v6, 0.0 }
 0x28a   : > { %803 = vadd.xlane.f32.xlu1 %v802_v7 }
 0x296   : > { %864 = vrot.lane.b32.xlu0 %v661_v50, %s1608_s9 }
 0x2a3   : > { %808 = vrot.lane.b32.xlu1 %v661_v50, %s1606_s20  ;;  %s1536_s20 = scalar_lea.hbm %s1535_s17, 8 }
 0x2a4   : > { %p1537_p12 = scmp.ne.s32.totalorder %s1535_s17, %s1536_s20  ;;  %p1542_p10 = scmp.lt.s32.totalorder %s1540_s7, %s1536_s20 }
 0x2a6   : > { %p1538_p2 = pnand %p1537_p12, %p1751_p4  ;;  %p1543_p6 = por %p1542_p10, %p1541_p8 }
 0x2a8   : > { %p1539_p1 = pneg %p1538_p2 }
 0x2aa   : > { %p1544_p11 = pnand %p1543_p6, %p1539_p1 }
 0x2e5   : > { %v747_v10 = vpop.xlane.xlu0 %746 }
 0x2e6   : > { %1304 = vrcp.f32 %v747_v10 }
 0x2ec   : > { %v1305_v11 = vpop.eup %1304 }
 0x2ed   : > { %v749_v12 = vmul.f32 %v1305_v11, %v1297_v56 }
 0x2ef   : > { %v750_v13 = vpack.c.bf16 %v749_v12, %v749_v12 }
 0x2f1   : > { %1159 = vmatmul.msk.bf16.vlgmr.msrb.gmra.mxu2 %vm662_vm1, %v750_v13 }
 0x2f5   : > { %v860_v14 = vpop.xlane.xlu0 %859 }
 0x2f6   : > { %1306 = vrcp.f32 %v860_v14 }
 0x2fc   : > { %v1307_v16 = vpop.eup %1306 }
 0x2fd   : > { %v862_v17 = vmul.f32 %v1307_v16, %v1299_v0  ;;  %v804_v18 = vpop.xlane.xlu1 %803 }
 0x2fe   : > { %1308 = vrcp.f32 %v804_v18 }
 0x2ff   : > { %v863_v21 = vpack.c.bf16 %v862_v17, %v862_v17 }
 0x303   : > { %v710_v15 = vpop.f32.mrf.mxu0 }
 0x304   : > { %v1309_v23 = vpop.eup %1308 }
 0x305   : > { %v806_v24 = vmul.f32 %v1309_v23, %v1303_v6 }
 0x307   : > { %v807_v27 = vpack.c.bf16 %v806_v24, %v806_v24 }
 0x308   : > { %v865_v19 = vpop.permute.xlu0 %864 }
 0x309   : > { %v870_v20 = vsel %vm697_vm2, %v865_v19, 0 }
 0x30a   : > { %879 = vmatpush.bf16.msra.mxu2 %v870_v20 }
 0x30b   : > { %v712_v22 = vpop.f32.mrf.mxu0 }
 0x30d   : > { %1163 = vmatmul.msk.bf16.vlgmr.msra.gmra.mxu2 %vm662_vm1, %v863_v21 }
 0x315   : > { %v809_v25 = vpop.permute.xlu1 %808 }
 0x316   : > { %v814_v26 = vsel %vm697_vm2, %v809_v25, 0 }
 0x317   : > { %823 = vmatpush.bf16.msra.mxu0 %v814_v26 }
 0x31a   : > { %1161 = vmatmul.msk.bf16.vlgmr.msra.gmra.mxu0 %vm662_vm1, %v807_v27 }
 0x374   : > { %v769_v28 = vpop.f32.mrf.mxu2 }
 0x375   : > { %886 = vrot.lane.b32.xlu2 %v769_v28, %s1609_s16 }
 0x37c   : > { %v771_v29 = vpop.f32.mrf.mxu2 }
 0x390   : > { %v881_v30 = vpop.f32.mrf.mxu2 }
 0x391   : > { %894 = vrot.lane.b32.xlu2 %v881_v30, %s1610_s5 }
 0x397   : > { %v825_v31 = vpop.f32.mrf.mxu0 }
 0x398   : > { %890 = vrot.lane.b32.xlu0 %v825_v31, %s1611_s3  ;;  %v883_v32 = vpop.f32.mrf.mxu2 }
 0x39f   : > { %v827_v33 = vpop.f32.mrf.mxu0 }
 0x3cf   : > { %v887_v36 = vpop.permute.xlu2 %886 }
 0x3d0   : > { %v897_v37 = vsel %vm662_vm1, %v710_v15, %v887_v36 }
 0x3eb   : > { %v895_v39 = vpop.permute.xlu2 %894 }
 0x40a   : > { %v891_v38 = vpop.permute.xlu0 %890 }
 0x40b   : > { %v899_v40 = vsel %vm898_vm3, %v897_v37, %v891_v38 }
 0x40c   : > { %v901_v41 = vsel %vm900_vm4, %v899_v40, %v895_v39 }
 0x40d   : > { %v902_v42 = vpack.c.bf16 %v901_v41, %v901_v41 }
 0x40f   : > { %1172 = vmatmul.msk.bf16.vlgmr.msra.gmra.mxu3 %vm569_vm0, %v902_v42 }
 0x492   : > { %v935_v44 = vpop.f32.mrf.mxu3 }
 0x493   : > { %v936_v45 = vadd.f32 %v1293_v43, %v935_v44 }
 0x495   : > { %939 = vst.msk [vmem:[%s544_s27] sm:$0xff] %vm569_vm0, %v936_v45 }
 0x496   : > { %1547 = shalt.err (!%p1544_p11)
}
 0x497   : > { %1207 = dma.vmem_to_hbm [thread:$0]  (%p1751_p4), %s954_s21, 128, %s956_s15, %s941_s24  }
 0x49a   : > { %v937_v46 = vpop.f32.mrf.mxu3 }
 0x49b PF: > { %s2012_s14 = sld [smem:[#allocation20_spill]] }
 0x49c   : > { %s2014_s3 = sld [smem:[#allocation21_spill]] }
 0x4a1   : > { %s967_s13 = sand.u32 1, %s2012_s14  }
 0x4a2   : > { %p2015_p13 = scmp.ge.s32.totalorder %s2014_s3, 2  ;;  %s968_s26 = scalar_lea.sflag [#allocation4], %s967_s13 }
 0x4a4   : > { %p1233_p3 = pnand %p2015_p13, %p1755_p5 }
 0x4a6   : > { %p1234_p7 = pneg %p1233_p3 }
 0x4a8   : > { %1581 = dma.done.wait (%p1234_p7), %s968_s26, 128  }
 0x4a9   : > { %1583 = vsyncadd (%p1234_p7), %s968_s26, 4294967168  ;;  %s2016_s20 = sld [smem:[#allocation22_spill]]  ;;  %s2018_s17 = smov %s1590_s18 }
 0x4aa   : > { %s2017_s23 = sld [smem:[#allocation23_spill]]  ;;  %s2019_s18 = smov %s1594_s19 }
 0x4af   : > { %p29_p9 = scmp.ge.s32.totalorder %s2016_s20, 4  }
 0x4b0   : > { %s2020_s19 = smov %s2017_s23 }
 0x4b1   :  { %31 = sbr.rel (!%p29_p9) target bundleno = 16 (0x10), region = 149 }
 0x4b6   :  { %974 = vsyncpa [#allocation3], 1 }
 0x4b7   :  { %976 = vsyncpa [#allocation3 + $0x1], 1 }
 0x4b8   :  { %977 = vsyncpa [#allocation6], 1 }
 0x4b9   :  { %979 = vsyncpa [#allocation6 + $0x1], 1 }
 0x4ba   :  { %980 = vsyncpa [#allocation9], 1 }
 0x4bb   :  { %981 = vsyncpa [#allocation12], 1 }
 0x4bc   :  { %982 = vsyncpa [#allocation4], 1 }
 0x4bd   :  { %984 = vsyncpa [#allocation4 + $0x1], 1 }

</bundles_post_ra>
